<compile_context>
chip_gen: v5e
topology: v5e:2x2
jax: 0.10.0
libtpu: 0.0.40
codegen_flags: <defaults>
</compile_context>

<pallas_src>
import functools

import jax
import jax.numpy as jnp
from jax.experimental import pallas as pl
from jax.experimental.pallas import tpu as pltpu


def _focal_loss_kernel(logits_ref, targets_ref, alpha_ref, out_ref, *,
                       gamma, n_total, tile_n):
    # Stream in native dtype, cast to f32 in-kernel.
    x_raw = logits_ref[...].astype(jnp.float32)   # (tile_n, C)
    t = targets_ref[...]                          # (tile_n, 1) int32
    a = alpha_ref[...].astype(jnp.float32)        # (1, C)
    tn, c = x_raw.shape

    # Row validity for the ragged last tile (rows past n_total are undefined
    # HBM data).  Mask with jnp.where BEFORE any exp / log-sum-exp so garbage
    # (inf/NaN bit patterns) cannot propagate.
    row_ids = (pl.program_id(0) * tile_n
               + jax.lax.broadcasted_iota(jnp.int32, (tn, 1), 0))
    row_valid = row_ids < n_total                                        # (tn, 1)
    x = jnp.where(row_valid, x_raw, 0.0)                                 # (tn, C)

    # One-hot target mask via iota compare (no gather on TPU).  Garbage
    # targets in invalid rows simply match nothing; those rows are zeroed
    # at the end anyway.
    class_ids = jax.lax.broadcasted_iota(jnp.int32, (tn, c), 1)
    is_tgt = class_ids == t                                              # (tn, C)

    # cross_entropy(inputs, targets, reduction='none') via stable log-sum-exp.
    m = jnp.max(x, axis=-1, keepdims=True)                               # (tn, 1)
    lse = m + jnp.log(jnp.sum(jnp.exp(x - m), axis=-1, keepdims=True))   # (tn, 1)
    tgt_logit = jnp.sum(jnp.where(is_tgt, x, 0.0), axis=-1, keepdims=True)
    ce = lse - tgt_logit                                                 # (tn, 1)

    # pt = exp(-ce); alpha[target] via masked row-reduce.
    pt = jnp.exp(-ce)
    alpha_t = jnp.sum(jnp.where(is_tgt, a, 0.0), axis=-1, keepdims=True)

    # (1 - pt) ** gamma specialized to a multiply chain for integer gamma
    # (g - 1 multiplies, starting from one_minus_pt), so it never becomes
    # exp(gamma * log(1 - pt)) on the single EUP slot.
    one_minus_pt = 1.0 - pt
    if float(gamma) == int(gamma) and int(gamma) >= 0:
        g = int(gamma)
        if g == 0:
            focal = jnp.ones_like(one_minus_pt)
        else:
            focal = one_minus_pt
            for _ in range(g - 1):
                focal = focal * one_minus_pt
    else:
        focal = one_minus_pt ** gamma

    per_sample = jnp.where(row_valid, alpha_t * focal * ce, 0.0)         # (tn, 1)
    partial = jnp.sum(per_sample)

    # Lane-dense partial-sum output block; wrapper reads [:, 0, 0].
    out_ref[...] = jnp.full((1, 8, 128), partial, dtype=jnp.float32)


def focal_loss(logits, targets, alpha, gamma=2):
    """logits: (N, C) float, targets: (N,) int, alpha: (C,) float -> scalar f32."""
    n, c = logits.shape

    # --- Generation-aware VMEM limit ------------------------------------
    try:
        vmem_phys = int(pltpu.get_tpu_info().vmem_capacity_bytes)
    except Exception:
        vmem_phys = 64 * 1024 * 1024          # conservative (v7x-sized) fallback
    # ~3/4 of physical, capped: ~96 MiB on v5e/v6e (128 MiB), ~48 MiB on v7x.
    vmem_limit = min((vmem_phys * 3) // 4, 96 * 1024 * 1024)
    budget = (vmem_limit * 4) // 5            # leave headroom for Mosaic scratch

    # --- Tile derivation, budgeted in f32 terms --------------------------
    c_eff = pl.cdiv(c, 128) * 128             # lane-padded footprint inside VMEM
    in_itemsize = jnp.dtype(logits.dtype).itemsize
    per_row_bytes = (
        2 * c_eff * in_itemsize               # double-buffered logits block (native dtype)
        + 2 * 128 * 4                         # double-buffered targets block (lane-pads to 128)
        + 6 * c_eff * 4                       # f32 intermediates (x, exp, iota, masks, ...)
    )
    tile_n = budget // per_row_bytes
    tile_n = max(8, min(4096, (tile_n // 8) * 8))
    tile_n = min(tile_n, pl.cdiv(n, 8) * 8)   # one tile for small problems

    num_tiles = pl.cdiv(n, tile_n)

    # Cheap reshapes only -- no padding / no copy of the (N, C) logits.
    targets_2d = targets.astype(jnp.int32).reshape(n, 1)
    alpha_2d = alpha.astype(jnp.float32).reshape(1, c)

    partials = pl.pallas_call(
        functools.partial(_focal_loss_kernel,
                          gamma=gamma, n_total=n, tile_n=tile_n),
        out_shape=jax.ShapeDtypeStruct((num_tiles, 8, 128), jnp.float32),
        grid=(num_tiles,),
        in_specs=[
            pl.BlockSpec((tile_n, c), lambda i: (i, 0)),   # logits tile (full class dim)
            pl.BlockSpec((tile_n, 1), lambda i: (i, 0)),   # targets tile
            pl.BlockSpec((1, c), lambda i: (0, 0)),        # alpha (resident)
        ],
        out_specs=pl.BlockSpec((1, 8, 128), lambda i: (i, 0, 0)),
        compiler_params=pltpu.CompilerParams(
            dimension_semantics=("parallel",),
            vmem_limit_bytes=int(vmem_limit),
        ),
    )(logits, targets_2d, alpha_2d)

    # Tiny final reduction + mean in the wrapper.
    return jnp.sum(partials[:, 0, 0]) / n


def _focal_loss_ref(logits, targets, alpha, gamma=2):
    logp = jax.nn.log_softmax(logits.astype(jnp.float32), axis=-1)
    ce = -jnp.take_along_axis(logp, targets[:, None], axis=-1)[:, 0]
    pt = jnp.exp(-ce)
    return jnp.mean(alpha[targets] * (1.0 - pt) ** gamma * ce)


if __name__ == "__main__":
    key = jax.random.PRNGKey(0)
    k1, k2 = jax.random.split(key)

    N, C = 8, 32                     # batch of 8 samples, 32 classes
    logits = jax.random.normal(k1, (N, C), dtype=jnp.float32)
    targets = jax.random.randint(k2, (N,), 0, C, dtype=jnp.int32)
    # deterministic per-class alpha weights (module takes alpha at __init__)
    alpha = jnp.linspace(0.25, 1.0, C, dtype=jnp.float32)
    gamma = 2

    loss = focal_loss(logits, targets, alpha, gamma)
    loss = jax.block_until_ready(loss)

    ref = _focal_loss_ref(logits, targets, alpha, gamma)
    assert jnp.allclose(loss, ref, rtol=1e-5, atol=1e-6), (loss, ref)

    print("KERNEL_OK")
</pallas_src>

<mosaic_0001>
module attributes {stable_mosaic.version = 11 : i64} {
  func.func @_focal_loss_kernel(%arg0: i32, %arg1: memref<8x32xf32, #tpu.memory_space<vmem>>, %arg2: memref<8x1xi32, #tpu.memory_space<vmem>>, %arg3: memref<1x32xf32, #tpu.memory_space<vmem>>, %arg4: memref<1x8x128xf32, #tpu.memory_space<vmem>>) attributes {dimension_semantics = [#tpu.dimension_semantics<parallel>], iteration_bounds = array<i64: 1>, scalar_prefetch = 0 : i64, scratch_operands = 0 : i64, tpu.core_type = #tpu.core_type<tc>, window_params = [{transform_indices = @transform_0, window_bounds = array<i64: 8, 32>}, {transform_indices = @transform_1, window_bounds = array<i64: 8, 1>}, {pipeline_mode = #tpu.pipeline_mode<synchronous>, transform_indices = @transform_2, window_bounds = array<i64: 1, 32>}, {transform_indices = @transform_3, window_bounds = array<i64: 1, 8, 128>}]} {
    %c0 = arith.constant 0 : index
    %c0_0 = arith.constant 0 : index
    %0 = vector.load %arg1[%c0, %c0_0] : memref<8x32xf32, #tpu.memory_space<vmem>>, vector<8x32xf32>
    %c0_1 = arith.constant 0 : index
    %c0_2 = arith.constant 0 : index
    %1 = vector.load %arg2[%c0_1, %c0_2] : memref<8x1xi32, #tpu.memory_space<vmem>>, vector<8x1xi32>
    %c0_3 = arith.constant 0 : index
    %c0_4 = arith.constant 0 : index
    %2 = vector.load %arg3[%c0_3, %c0_4] : memref<1x32xf32, #tpu.memory_space<vmem>>, vector<1x32xf32>
    %c8_i32 = arith.constant 8 : i32
    %3 = arith.muli %arg0, %c8_i32 : i32
    %4 = tpu.iota {dimensions = array<i32: 0>} : vector<8x1xi32>
    %5 = vector.broadcast %3 : i32 to vector<8x1xi32>
    %6 = arith.addi %5, %4 : vector<8x1xi32>
    %c8_i32_5 = arith.constant 8 : i32
    %7 = vector.broadcast %c8_i32_5 : i32 to vector<8x1xi32>
    %8 = arith.cmpi slt, %6, %7 : vector<8x1xi32>
    %cst = arith.constant 0.000000e+00 : f32
    %9 = vector.shape_cast %8 : vector<8x1xi1> to vector<8x1xi1>
    %10 = vector.broadcast %9 : vector<8x1xi1> to vector<8x32xi1>
    %11 = vector.broadcast %cst : f32 to vector<8x32xf32>
    %12 = arith.select %10, %0, %11 : vector<8x32xi1>, vector<8x32xf32>
    %13 = tpu.iota {dimensions = array<i32: 1>} : vector<8x32xi32>
    %14 = vector.broadcast %1 : vector<8x1xi32> to vector<8x32xi32>
    %15 = arith.cmpi eq, %13, %14 : vector<8x32xi32>
    %cst_6 = arith.constant dense<0xFF800000> : vector<8xf32>
    %16 = vector.multi_reduction <maximumf>, %12, %cst_6 [1] : vector<8x32xf32> to vector<8xf32>
    %17 = vector.shape_cast %16 : vector<8xf32> to vector<8x1xf32>
    %18 = vector.broadcast %17 : vector<8x1xf32> to vector<8x32xf32>
    %19 = arith.subf %12, %18 : vector<8x32xf32>
    %20 = math.exp %19 : vector<8x32xf32>
    %cst_7 = arith.constant dense<0.000000e+00> : vector<8xf32>
    %21 = vector.multi_reduction <add>, %20, %cst_7 [1] : vector<8x32xf32> to vector<8xf32>
    %22 = vector.shape_cast %21 : vector<8xf32> to vector<8x1xf32>
    %23 = math.log %22 : vector<8x1xf32>
    %24 = arith.addf %17, %23 : vector<8x1xf32>
    %cst_8 = arith.constant 0.000000e+00 : f32
    %25 = vector.broadcast %cst_8 : f32 to vector<8x32xf32>
    %26 = arith.select %15, %12, %25 : vector<8x32xi1>, vector<8x32xf32>
    %cst_9 = arith.constant dense<0.000000e+00> : vector<8xf32>
    %27 = vector.multi_reduction <add>, %26, %cst_9 [1] : vector<8x32xf32> to vector<8xf32>
    %28 = vector.shape_cast %27 : vector<8xf32> to vector<8x1xf32>
    %29 = arith.subf %24, %28 : vector<8x1xf32>
    %cst_10 = arith.constant 0.000000e+00 : f32
    %30 = vector.broadcast %cst_10 : f32 to vector<8x1xf32>
    %31 = arith.subf %30, %29 : vector<8x1xf32>
    %32 = math.exp %31 : vector<8x1xf32>
    %cst_11 = arith.constant 0.000000e+00 : f32
    %33 = vector.shape_cast %2 : vector<1x32xf32> to vector<1x32xf32>
    %34 = vector.broadcast %33 : vector<1x32xf32> to vector<8x32xf32>
    %35 = vector.broadcast %cst_11 : f32 to vector<8x32xf32>
    %36 = arith.select %15, %34, %35 : vector<8x32xi1>, vector<8x32xf32>
    %cst_12 = arith.constant dense<0.000000e+00> : vector<8xf32>
    %37 = vector.multi_reduction <add>, %36, %cst_12 [1] : vector<8x32xf32> to vector<8xf32>
    %38 = vector.shape_cast %37 : vector<8xf32> to vector<8x1xf32>
    %cst_13 = arith.constant 1.000000e+00 : f32
    %39 = vector.broadcast %cst_13 : f32 to vector<8x1xf32>
    %40 = arith.subf %39, %32 : vector<8x1xf32>
    %41 = arith.mulf %40, %40 : vector<8x1xf32>
    %42 = arith.mulf %38, %41 : vector<8x1xf32>
    %43 = arith.mulf %42, %29 : vector<8x1xf32>
    %cst_14 = arith.constant 0.000000e+00 : f32
    %44 = vector.broadcast %cst_14 : f32 to vector<8x1xf32>
    %45 = arith.select %8, %43, %44 : vector<8x1xi1>, vector<8x1xf32>
    %46 = vector.shape_cast %45 : vector<8x1xf32> to vector<1x8x1xf32>
    %cst_15 = arith.constant dense<0.000000e+00> : vector<1xf32>
    %47 = vector.multi_reduction <add>, %46, %cst_15 [1, 2] : vector<1x8x1xf32> to vector<1xf32>
    %48 = vector.shape_cast %47 : vector<1xf32> to vector<1x1x1xf32>
    %49 = vector.extract %48[0, 0, 0] : f32 from vector<1x1x1xf32>
    %50 = vector.broadcast %49 : f32 to vector<1x8x128xf32>
    %c0_16 = arith.constant 0 : index
    %c0_17 = arith.constant 0 : index
    %c0_18 = arith.constant 0 : index
    %51 = vector.load %arg4[%c0_16, %c0_17, %c0_18] : memref<1x8x128xf32, #tpu.memory_space<vmem>>, vector<1x8x128xf32>
    tpu.vector_store %arg4[%c0_16, %c0_17, %c0_18], %50 {strides = array<i32>} : memref<1x8x128xf32, #tpu.memory_space<vmem>>, vector<1x8x128xf32>,
    return
  }
  func.func @transform_0(%arg0: i32) -> (i32, i32) {
    %c0_i32 = arith.constant 0 : i32
    %c0_i32_0 = arith.constant 0 : i32
    return %arg0, %c0_i32 : i32, i32
  }
  func.func @transform_1(%arg0: i32) -> (i32, i32) {
    %c0_i32 = arith.constant 0 : i32
    %c0_i32_0 = arith.constant 0 : i32
    return %arg0, %c0_i32 : i32, i32
  }
  func.func @transform_2(%arg0: i32) -> (i32, i32) {
    %c0_i32 = arith.constant 0 : i32
    %c0_i32_0 = arith.constant 0 : i32
    %c0_i32_1 = arith.constant 0 : i32
    return %c0_i32, %c0_i32_0 : i32, i32
  }
  func.func @transform_3(%arg0: i32) -> (i32, i32, i32) {
    %c0_i32 = arith.constant 0 : i32
    %c0_i32_0 = arith.constant 0 : i32
    %c0_i32_1 = arith.constant 0 : i32
    return %arg0, %c0_i32, %c0_i32_0 : i32, i32, i32
  }
}

</mosaic_0001>

<bundles_post_ra>
// kernel: tpu_custom_call.1
= control target key start
LH: loop header
LB: loop body
LE: loop exit
PB: predicated region body
PF: predicated region fallthrough
CT: control target
= control target key end

     0   :  { %vm33_vm0 = vcmask 261120   ;;  %v133_v2 = vmov 0   ;;  %s171_s0 = inlined_call_operand.vmem [shape: f32[8,32], index: 0, kind: input, shape index: {}]   ;;  %s172_s1 = inlined_call_operand.vmem [shape: s32[8,1], index: 1, kind: input, shape index: {}]   ;;  %s173_s2 = inlined_call_operand.vmem [shape: f32[1,32], index: 2, kind: input, shape index: {}]   ;;  %s174_s3 = inlined_call_operand.hbm [shape: f32[1,8,128], index: 3, kind: output, shape index: {}]  }
   0x1   :  { %v15_v0 = vld [vmem:[%s171_s0] sm:$0xff]  ;;  %99 = vset.pattern.permute.xlu0 %v133_v2 }
   0x2   :  { %v34_v1 = vsel %vm33_vm0, %v15_v0, -inf }
   0x3   :  { %8 = vsyncpa [#allocation3], 0  ;;  %35 = vmax.xlane.f32.xlu0 %v34_v1  ;;  %v16_v3 = vld [vmem:[%s172_s1] sm:$0xff]  ;;  %v27_v9 = vlaneseq  ;;  %vm66_vm2 = vcmask 7168   ;;  %s134_s1 = smov [#allocation2]   ;;  %s86_s19 = sshll.u32 %s174_s3, 4  ;;  %s87_s19 = int_to_ptr.hbm [resolvable:$true] %s86_s19 }
   0x4   :  { %v100_v11 = vld [vmem:[%s173_s2] ss:$0 sm:$0xff]  ;;  %s84_s2 = sshll.u32 %s134_s1, 4  ;;  %s85_s2 = int_to_ptr.vmem [resolvable:$true] %s84_s2 }
   0x5   :  { %v28_v10 = vand.u32 127, %v27_v9 }
  0x17   :  { %30 = vperm.xlu0 %99, %v16_v3  }
  0x76   :  { %v36_v4 = vpop.xlane.xlu0 %35 }
  0x77   :  { %v37_v5 = vsub.f32 %v15_v0, %v36_v4 }
  0x79   :  { %v38_v6 = vmul.f32 1.442695, %v37_v5 }
  0x7b   :  { %101 = vpow2.f32 %v38_v6 }
  0x81   :  { %v102_v7 = vpop.eup %101 }
  0x82   :  { %v40_v8 = vsel %vm33_vm0, %v102_v7, 0.0 }
  0x83   :  { %41 = vadd.xlane.f32.xlu1 %v40_v8 }
  0x89   :  { %v31_v12 = vpop.permute.xlu0 %30 }
  0x8a   :  { %vm32_vm1 = vcmp.eq.s32.totalorder %v28_v10, %v31_v12 }
  0x8b   :  { %v57_v13 = vsel %vm32_vm1, %v100_v11, 0.0  ;;  %v46_v14 = vsel %vm32_vm1, %v15_v0, 0.0 }
  0x8c   :  { %v58_v15 = vsel %vm33_vm0, %v57_v13, 0.0  ;;  %v47_v16 = vsel %vm33_vm0, %v46_v14, 0.0 }
  0x8d   :  { %59 = vadd.xlane.f32.xlu2 %v58_v15  ;;  %48 = vadd.xlane.f32.xlu1 %v47_v16 }
  0xf6   :  { %v42_v17 = vpop.xlane.xlu1 %41 }
  0xf7   :  { %103 = vlog2.f32 %v42_v17 }
  0xfd   :  { %v104_v18 = vpop.eup %103 }
  0xfe   :  { %v44_v19 = vmul.f32 0.6931472, %v104_v18 }
 0x100   :  { %v45_v20 = vadd.f32 %v44_v19, %v36_v4  ;;  %v49_v21 = vpop.xlane.xlu1 %48  ;;  %v60_v28 = vpop.xlane.xlu2 %59 }
 0x102   :  { %v50_v22 = vsub.f32 %v45_v20, %v49_v21 }
 0x104   :  { %v51_v23 = vsub.f32 0.0, %v50_v22 }
 0x106   :  { %v52_v24 = vmul.f32 1.442695, %v51_v23 }
 0x108   :  { %105 = vpow2.f32 %v52_v24 }
 0x10e   :  { %v106_v25 = vpop.eup %105 }
 0x10f   :  { %v61_v26 = vsub.f32 1.0, %v106_v25 }
 0x111   :  { %v62_v27 = vmul.f32 %v61_v26, %v61_v26 }
 0x113   :  { %v63_v29 = vmul.f32 %v62_v27, %v60_v28 }
 0x115   :  { %v64_v30 = vmul.f32 %v63_v29, %v50_v22 }
 0x117   :  { %v67_v31 = vsel %vm66_vm2, %v64_v30, 0.0 }
 0x118   :  { %68 = vadd.xlane.f32.xlu2 %v67_v31 }
 0x18b   :  { %v69_v32 = vpop.xlane.xlu2 %68 }
 0x18c   :  { %v70_v33 = vrot.slane %v69_v32, 4 }
 0x18e   :  { %v71_v34 = vadd.f32 %v70_v33, %v69_v32 }
 0x190   :  { %v72_v35 = vrot.slane %v71_v34, 2 }
 0x192   :  { %v73_v36 = vadd.f32 %v72_v35, %v71_v34 }
 0x194   :  { %v74_v37 = vrot.slane %v73_v36, 1 }
 0x196   :  { %v75_v38 = vadd.f32 %v74_v37, %v73_v36 }
 0x198   :  { %95 = vpush %v75_v38 }
 0x1c9   :  { %s96_s20 = spop %95 }
 0x1ca   :  { %v77_v39 = vstv %s96_s20 }
 0x1cb   :  { %78 = vst [vmem:[#allocation2] sm:$0xff] %v77_v39 }
 0x1cc   :  { %89 = dma.vmem_to_hbm [thread:$0]  %s85_s2, 128, %s87_s19, [#allocation3]  }
 0x1cd   :  { %131 = dma.done.wait [#allocation3], 128  }
 0x1ce   :  { %132 = vsyncadd [#allocation3], 4294967168 }
 0x1cf   :  { %94 = vsyncpa [#allocation3], 1 }

</bundles_post_ra>
